<compile_context>
chip_gen: v7x
topology: tpu7x:2x2x1
jax: 0.10.0
libtpu: 0.0.40
codegen_flags: <defaults>
</compile_context>

<pallas_src>
import jax
import jax.numpy as jnp
from jax.experimental import pallas as pl
from jax.experimental.pallas import tpu as pltpu

BN_EPS = 1e-05


def _swish(v):
    # MemoryEfficientSwish forward: v * sigmoid(v).
    # exp -> EUP, approx reciprocal -> EUP vrcp (separate VLIW slot, ~free when DMA-bound).
    return v * pl.reciprocal(1.0 + jnp.exp(-v), approx=True)


def dense_block_kernel(x_ref, w1_ref, b1_ref, w2_ref, b2_ref, out_ref):
    x = x_ref[...].astype(jnp.float32)                                   # [TB, D_in]

    # Linear1 (BN scale pre-folded into w1 columns), shift, Swish.
    h = jnp.dot(x, w1_ref[...], preferred_element_type=jnp.float32)      # [TB, H]
    h = _swish(h + b1_ref[...])

    # Linear2 (BN scale pre-folded into w2 columns), shift, Swish.
    y = jnp.dot(h, w2_ref[...], preferred_element_type=jnp.float32)      # [TB, D_out]
    y = _swish(y + b2_ref[...])

    # concat([xx, x], dim=1) built in-register -> single full-width store.
    out_ref[...] = jnp.concatenate([y, x], axis=1).astype(out_ref.dtype)


def dense_block(x, w1, gamma1, beta1, mean1, var1, w2, gamma2, beta2, mean2, var2,
                *, block_b=512):
    B, D_in = x.shape
    H = w1.shape[1]
    D_out = w2.shape[1]
    D_cat = D_out + D_in

    # ---- one-time glue: fold eval-mode BN into weights (scale) + shift vectors ----
    inv1 = gamma1 / jnp.sqrt(var1 + BN_EPS)
    inv2 = gamma2 / jnp.sqrt(var2 + BN_EPS)
    w1f = (w1 * inv1[None, :]).astype(jnp.float32)          # (x @ w1) * s1 == x @ (w1 * s1)
    w2f = (w2 * inv2[None, :]).astype(jnp.float32)
    b1 = (beta1 - mean1 * inv1).reshape(1, H).astype(jnp.float32)
    b2 = (beta2 - mean2 * inv2).reshape(1, D_out).astype(jnp.float32)
    # NOTE(v5e): if accuracy allows, cast x/w1f/w2f to bfloat16 here (keep f32 accumulation)
    # to halve MXU passes and x's DMA bytes.

    # ---- batch tiling: sublane-aligned TB, pad B to a multiple, grid over batch ----
    TB = min(block_b, B)
    TB = max(8, ((TB + 7) // 8) * 8)                         # f32 sublane alignment
    n_blocks = pl.cdiv(B, TB)
    B_pad = n_blocks * TB
    x_in = x if B_pad == B else jnp.pad(x, ((0, B_pad - B), (0, 0)))

    # Explicit VMEM budget: double-buffered x/out tiles + resident params, with headroom,
    # capped below v7x's 64 MiB physical VMEM (v5e/v6e have 128 MiB, so this is safe there too).
    tile_bytes = TB * (D_in + D_cat) * 4
    resident_bytes = (D_in * H + H * D_out + H + D_out) * 4
    vmem_limit = int(min(max(4 * (2 * tile_bytes + resident_bytes), 32 << 20), 48 << 20))

    out = pl.pallas_call(
        dense_block_kernel,
        out_shape=jax.ShapeDtypeStruct((B_pad, D_cat), x.dtype),
        grid=(n_blocks,),
        in_specs=[
            pl.BlockSpec((TB, D_in), lambda i: (i, 0)),      # x: streamed per batch tile
            pl.BlockSpec((D_in, H), lambda i: (0, 0)),       # w1 (scale-folded): resident
            pl.BlockSpec((1, H), lambda i: (0, 0)),          # b1 shift: resident
            pl.BlockSpec((H, D_out), lambda i: (0, 0)),      # w2 (scale-folded): resident
            pl.BlockSpec((1, D_out), lambda i: (0, 0)),      # b2 shift: resident
        ],
        out_specs=pl.BlockSpec((TB, D_cat), lambda i: (i, 0)),
        compiler_params=pltpu.CompilerParams(
            dimension_semantics=("parallel",),
            vmem_limit_bytes=vmem_limit,
        ),
    )(x_in, w1f, b1, w2f, b2)

    return out[:B] if B_pad != B else out


def dense_block_ref(x, w1, gamma1, beta1, mean1, var1, w2, gamma2, beta2, mean2, var2):
    h = x @ w1
    h = (h - mean1) / jnp.sqrt(var1 + BN_EPS) * gamma1 + beta1
    h = h * jax.nn.sigmoid(h)
    y = h @ w2
    y = (y - mean2) / jnp.sqrt(var2 + BN_EPS) * gamma2 + beta2
    y = y * jax.nn.sigmoid(y)
    return jnp.concatenate([y, x], axis=1)


if __name__ == "__main__":
    # Small shapes consistent with DenseBlock(input_dim=32, output_dim=32): hidden = 32 // 4 = 8.
    # B=20 with block_b=8 exercises the batch grid (3 steps) + the pad/slice path.
    B, D_in, D_out = 20, 32, 32
    H = D_out // 4

    key = jax.random.PRNGKey(0)
    keys = jax.random.split(key, 10)
    x      = jax.random.normal(keys[0], (B, D_in), dtype=jnp.float32)
    w1     = jax.random.normal(keys[1], (D_in, H), dtype=jnp.float32) * 0.1
    w2     = jax.random.normal(keys[2], (H, D_out), dtype=jnp.float32) * 0.1
    gamma1 = jax.random.uniform(keys[3], (H,), minval=0.5, maxval=1.5, dtype=jnp.float32)
    beta1  = jax.random.normal(keys[4], (H,), dtype=jnp.float32) * 0.1
    mean1  = jax.random.normal(keys[5], (H,), dtype=jnp.float32) * 0.1
    var1   = jax.random.uniform(keys[6], (H,), minval=0.5, maxval=1.5, dtype=jnp.float32)
    gamma2 = jax.random.uniform(keys[7], (D_out,), minval=0.5, maxval=1.5, dtype=jnp.float32)
    beta2  = jax.random.normal(keys[8], (D_out,), dtype=jnp.float32) * 0.1
    mean2  = jax.random.normal(keys[9], (D_out,), dtype=jnp.float32) * 0.1
    var2   = jnp.ones((D_out,), dtype=jnp.float32) * 0.9

    out = dense_block(x, w1, gamma1, beta1, mean1, var1, w2, gamma2, beta2, mean2, var2,
                      block_b=8)
    out = jax.block_until_ready(out)

    ref = dense_block_ref(x, w1, gamma1, beta1, mean1, var1, w2, gamma2, beta2, mean2, var2)
    assert out.shape == (B, D_out + D_in), out.shape
    # Loose-ish tolerance: the approx EUP reciprocal in the sigmoid introduces a tiny
    # (typically <1e-3) relative error vs the exact reference.
    assert jnp.allclose(out, ref, atol=1e-2, rtol=1e-2), float(jnp.max(jnp.abs(out - ref)))

    print("KERNEL_OK")
</pallas_src>

<mosaic_0001>
module attributes {stable_mosaic.version = 11 : i64} {
  func.func @dense_block_kernel(%arg0: i32, %arg1: memref<8x32xf32, #tpu.memory_space<vmem>>, %arg2: memref<32x8xf32, #tpu.memory_space<vmem>>, %arg3: memref<1x8xf32, #tpu.memory_space<vmem>>, %arg4: memref<8x32xf32, #tpu.memory_space<vmem>>, %arg5: memref<1x32xf32, #tpu.memory_space<vmem>>, %arg6: memref<8x64xf32, #tpu.memory_space<vmem>>) attributes {dimension_semantics = [#tpu.dimension_semantics<parallel>], iteration_bounds = array<i64: 3>, scalar_prefetch = 0 : i64, scratch_operands = 0 : i64, tpu.core_type = #tpu.core_type<tc>, window_params = [{transform_indices = @transform_0, window_bounds = array<i64: 8, 32>}, {pipeline_mode = #tpu.pipeline_mode<synchronous>, transform_indices = @transform_1, window_bounds = array<i64: 32, 8>}, {pipeline_mode = #tpu.pipeline_mode<synchronous>, transform_indices = @transform_2, window_bounds = array<i64: 1, 8>}, {pipeline_mode = #tpu.pipeline_mode<synchronous>, transform_indices = @transform_3, window_bounds = array<i64: 8, 32>}, {pipeline_mode = #tpu.pipeline_mode<synchronous>, transform_indices = @transform_4, window_bounds = array<i64: 1, 32>}, {transform_indices = @transform_5, window_bounds = array<i64: 8, 64>}]} {
    %c0 = arith.constant 0 : index
    %c0_0 = arith.constant 0 : index
    %0 = vector.load %arg1[%c0, %c0_0] : memref<8x32xf32, #tpu.memory_space<vmem>>, vector<8x32xf32>
    %c0_1 = arith.constant 0 : index
    %c0_2 = arith.constant 0 : index
    %1 = vector.load %arg2[%c0_1, %c0_2] : memref<32x8xf32, #tpu.memory_space<vmem>>, vector<32x8xf32>
    %cst = arith.constant dense<0.000000e+00> : vector<8x8xf32>
    %2 = tpu.matmul %0, %1, %cst {dimension_numbers = #tpu.dot_dimension_numbers<[1], [0], [0], [1], [0, 0, 1, 1], [], []>} : vector<8x32xf32>, vector<32x8xf32>, vector<8x8xf32> -> vector<8x8xf32>
    %c0_3 = arith.constant 0 : index
    %c0_4 = arith.constant 0 : index
    %3 = vector.load %arg3[%c0_3, %c0_4] : memref<1x8xf32, #tpu.memory_space<vmem>>, vector<1x8xf32>
    %4 = vector.broadcast %3 : vector<1x8xf32> to vector<8x8xf32>
    %5 = arith.addf %2, %4 : vector<8x8xf32>
    %cst_5 = arith.constant 0.000000e+00 : f32
    %6 = vector.broadcast %cst_5 : f32 to vector<8x8xf32>
    %7 = arith.subf %6, %5 : vector<8x8xf32>
    %8 = math.exp %7 : vector<8x8xf32>
    %cst_6 = arith.constant 1.000000e+00 : f32
    %9 = vector.broadcast %cst_6 : f32 to vector<8x8xf32>
    %10 = arith.addf %9, %8 : vector<8x8xf32>
    %11 = tpu.reciprocal %10 {approx = true} : vector<8x8xf32> -> vector<8x8xf32>
    %12 = arith.mulf %5, %11 : vector<8x8xf32>
    %c0_7 = arith.constant 0 : index
    %c0_8 = arith.constant 0 : index
    %13 = vector.load %arg4[%c0_7, %c0_8] : memref<8x32xf32, #tpu.memory_space<vmem>>, vector<8x32xf32>
    %cst_9 = arith.constant dense<0.000000e+00> : vector<8x32xf32>
    %14 = tpu.matmul %12, %13, %cst_9 {dimension_numbers = #tpu.dot_dimension_numbers<[1], [0], [0], [1], [0, 0, 1, 1], [], []>} : vector<8x8xf32>, vector<8x32xf32>, vector<8x32xf32> -> vector<8x32xf32>
    %c0_10 = arith.constant 0 : index
    %c0_11 = arith.constant 0 : index
    %15 = vector.load %arg5[%c0_10, %c0_11] : memref<1x32xf32, #tpu.memory_space<vmem>>, vector<1x32xf32>
    %16 = vector.broadcast %15 : vector<1x32xf32> to vector<8x32xf32>
    %17 = arith.addf %14, %16 : vector<8x32xf32>
    %cst_12 = arith.constant 0.000000e+00 : f32
    %18 = vector.broadcast %cst_12 : f32 to vector<8x32xf32>
    %19 = arith.subf %18, %17 : vector<8x32xf32>
    %20 = math.exp %19 : vector<8x32xf32>
    %cst_13 = arith.constant 1.000000e+00 : f32
    %21 = vector.broadcast %cst_13 : f32 to vector<8x32xf32>
    %22 = arith.addf %21, %20 : vector<8x32xf32>
    %23 = tpu.reciprocal %22 {approx = true} : vector<8x32xf32> -> vector<8x32xf32>
    %24 = arith.mulf %17, %23 : vector<8x32xf32>
    %25 = tpu.concatenate %24, %0 in 1 : vector<8x32xf32>, vector<8x32xf32> -> vector<8x64xf32>
    %c0_14 = arith.constant 0 : index
    %c0_15 = arith.constant 0 : index
    %26 = vector.load %arg6[%c0_14, %c0_15] : memref<8x64xf32, #tpu.memory_space<vmem>>, vector<8x64xf32>
    tpu.vector_store %arg6[%c0_14, %c0_15], %25 {strides = array<i32>} : memref<8x64xf32, #tpu.memory_space<vmem>>, vector<8x64xf32>,
    return
  }
  func.func @transform_0(%arg0: i32) -> (i32, i32) {
    %c0_i32 = arith.constant 0 : i32
    %c0_i32_0 = arith.constant 0 : i32
    return %arg0, %c0_i32 : i32, i32
  }
  func.func @transform_1(%arg0: i32) -> (i32, i32) {
    %c0_i32 = arith.constant 0 : i32
    %c0_i32_0 = arith.constant 0 : i32
    %c0_i32_1 = arith.constant 0 : i32
    return %c0_i32, %c0_i32_0 : i32, i32
  }
  func.func @transform_2(%arg0: i32) -> (i32, i32) {
    %c0_i32 = arith.constant 0 : i32
    %c0_i32_0 = arith.constant 0 : i32
    %c0_i32_1 = arith.constant 0 : i32
    return %c0_i32, %c0_i32_0 : i32, i32
  }
  func.func @transform_3(%arg0: i32) -> (i32, i32) {
    %c0_i32 = arith.constant 0 : i32
    %c0_i32_0 = arith.constant 0 : i32
    %c0_i32_1 = arith.constant 0 : i32
    return %c0_i32, %c0_i32_0 : i32, i32
  }
  func.func @transform_4(%arg0: i32) -> (i32, i32) {
    %c0_i32 = arith.constant 0 : i32
    %c0_i32_0 = arith.constant 0 : i32
    %c0_i32_1 = arith.constant 0 : i32
    return %c0_i32, %c0_i32_0 : i32, i32
  }
  func.func @transform_5(%arg0: i32) -> (i32, i32) {
    %c0_i32 = arith.constant 0 : i32
    %c0_i32_0 = arith.constant 0 : i32
    return %arg0, %c0_i32 : i32, i32
  }
}

</mosaic_0001>

<bundles_post_ra>
// kernel: tpu_custom_call.1
= control target key start
LH: loop header
LB: loop body
LE: loop exit
PB: predicated region body
PF: predicated region fallthrough
CT: control target
= control target key end

     0   :  { %10 = vsyncpa [#allocation3], 0  ;;  %s795_s0 = inlined_call_operand.vmem [shape: f32[24,32], index: 0, kind: input, shape index: {}]   ;;  %s796_s1 = inlined_call_operand.vmem [shape: f32[32,8], index: 1, kind: input, shape index: {}]   ;;  %s797_s2 = inlined_call_operand.vmem [shape: f32[1,8], index: 2, kind: input, shape index: {}]   ;;  %s798_s3 = inlined_call_operand.vmem [shape: f32[8,32], index: 3, kind: input, shape index: {}]   ;;  %s799_s4 = inlined_call_operand.vmem [shape: f32[1,32], index: 4, kind: input, shape index: {}]   ;;  %s800_s5 = inlined_call_operand.hbm [shape: f32[24,64], index: 5, kind: output, shape index: {}]  }
   0x1   :  { %12 = vsyncpa [#allocation3 + $0x1], 0  ;;  %s672_s18 = smov 0   ;;  %s674_s19 = smov 0  }
   0x2   :  { %s676_s20 = smov 0   ;;  %s678_s21 = smov 0  }
   0x3 LB: > { %s693_s22 = sadd.s32 4294967295, %s635_s21   ;;  %s479_s23 = sadd.s32 4294967294, %s635_s21   ;;  %s635_s21 = sphi %s678_s21, %s806_s21   ;;  %s631_s20 = sphi %s676_s20, %s805_s20   ;;  %s627_s19 = sphi %s674_s19, %s804_s19   ;;  %s623_s18 = sphi %s672_s18, %s803_s18  }
   0x4   : > { %s697_s24 = sadd.s32 1, %s635_s21   ;;  %s135_s25 = sadd.s32 1, %s631_s20 }
   0x5   : > { %s132_s26 = ssub.s32 %s635_s21, %s697_s24  ;;  %p145_p0 = scmp.ne.s32.totalorder %s631_s20, %s627_s19 }
   0x6   : > { %p133_p1 = scmp.eq.s32.totalorder %s132_s26, 0  ;;  %p146_p2 = scmp.eq.s32.totalorder %s693_s22, 2 }
   0x7   : > { %p151_p3 = scmp.ne.s32.totalorder %s627_s19, %s623_s18  ;;  %p152_p4 = scmp.eq.s32.totalorder %s479_s23, 2 }
   0x8   : > { %s708_s27 = scalar_select %p133_p1, %s631_s20, %s135_s25  }
   0x9   : > { %p710_p5 = por %p146_p2, %p145_p0  ;;  %p714_p6 = por %p152_p4, %p151_p3 }
   0xa   : > { %p482_p7 = scmp.ge.s32.totalorder %s635_s21, 1  ;;  %p189_p8 = scmp.lt.s32.totalorder %s635_s21, 4 }
   0xc   : > { %p190_p9 = pnand %p482_p7, %p189_p8 }
   0xd   : > { %v221_v0 = vld [vmem:[%s796_s1] sm:$0xff] (!%p190_p9)  ;;  %v222_v1 = vld [vmem:[%s796_s1 + $0x8] sm:$0xff] (!%p190_p9)  ;;  %v223_v2 = vld [vmem:[%s796_s1 + $0x10] sm:$0xff] (!%p190_p9)  ;;  %v637_v3 = vmov (!%p190_p9), 0.0|0.0   ;;  %vm638_vm0 = vmmov (!%p190_p9), 0   ;;  %v639_v6 = vmov (!%p190_p9), 0.0  }
   0xe   : > { %193 = sbr.rel (%p190_p9) target bundleno = 529 (0x211), region = 40  ;;  %516 = vmatprep.subr.bf16.mxu0 (!%p190_p9), %v637_v3  ;;  %v517_v4 = vpack.c.bf16 (!%p190_p9), %v222_v1, %v221_v0  ;;  %v224_v5 = vld [vmem:[%s796_s1 + $0x18] sm:$0xff] (!%p190_p9)  ;;  %508 = vmatprep.mubr.msk.f32.mxu0 (!%p190_p9), %vm638_vm0, %v639_v6  ;;  %p216_p10 = scmp.lt.s32.totalorder (!%p190_p9), %s693_s22, 2  ;;  %vm232_vm1 = vcmask (!%p190_p9), 261120   ;;  %v312_v9 = vld [vmem:[%s798_s3] sm:$0xff] (!%p190_p9)  ;;  %vm320_vm2 = vcmask (!%p190_p9), 64512  }
   0xf   : > { %511 = vmatprep.subr.mxu1 (!%p190_p9), %v639_v6  ;;  %513 = vmatprep.mubr.msk.f32.mxu1 (!%p190_p9), %vm638_vm0, %v639_v6  ;;  %v520_v7 = vpack.c.bf16 (!%p190_p9), %v224_v5, %v223_v2  ;;  %s640_s26 = smov (!%p190_p9), 32   ;;  %v485_v10 = vld [vmem:[%s797_s2] ss:$0 sm:$0xff] (!%p190_p9)  ;;  %s213_s9 = sand.u32 (!%p190_p9), 1, %s627_s19   ;;  %vm404_vm3 = vcmask (!%p190_p9), 523264  }
  0x10   : > { %518 = vmatpush3.bf16.msra.mxu0 (!%p190_p9), %v517_v4  ;;  %512 = vmatpush3.msra.mxu1 (!%p190_p9), %v312_v9  ;;  %v487_v20 = vld [vmem:[%s799_s4] ss:$0 sm:$0xff] (!%p190_p9)  ;;  %s483_s10 = sshll.u32 (!%p190_p9), %s213_s9, 3  ;;  %s490_s11 = sshll.u32 (!%p190_p9), %s693_s22, 7 }
  0x11   : > { %519 = vmatprep.subr.bf16.mxu0 (!%p190_p9), %v637_v3  ;;  %s215_s12 = scalar_lea.vmem (!%p190_p9), [#allocation2], %s483_s10  ;;  %s752_s16 = scalar_lea.hbm (!%p190_p9), %s800_s5, %s490_s11 }
  0x12   : > { %s641_s23 = smov (!%p190_p9), [#allocation2]  }
  0x13   : > { %s577_s25 = sshll.u32 (!%p190_p9), %s641_s23, 4  ;;  %s578_s25 = int_to_ptr.vmem [resolvable:$false] %s577_s25 }
  0x14   : > { %521 = vmatpush3.bf16.msra.mxu0 (!%p190_p9), %v520_v7 }
  0x15   : > { %s217_s13 = scalar_select %p216_p10, %s693_s22, 2 }
  0x16   : > { %s407_s22 = scalar_lea.sflag [#allocation3], %s213_s9 }
  0x17   : > { %s484_s14 = sshll.u32 %s217_s13, 3  ;;  %s420_s13 = sshll.u32 %s215_s12, 4  ;;  %s754_s13 = int_to_ptr.vmem [resolvable:$true] %s420_s13 }
  0x18   : > { %s219_s17 = scalar_lea.vmem %s795_s0, %s484_s14  ;;  %p580_p0 = scmp.lt.s32.totalorder %s754_s13, %s578_s25 }
  0x19   : > { %v220_v8 = vld [vmem:[%s219_s17] sm:$0xff]  ;;  %s573_s17 = scalar_lea.vmem %s754_s13, 128 }
  0x1a   : > { %509 = vmatmul.mubr.msk.f32.vlgmr.msra.gmra.mrb[0].mxu0 %vm232_vm1, %v220_v8  ;;  %400 = vrot.lane.b32.xlu0 %v220_v8, %s640_s26  ;;  %p574_p11 = scmp.ne.s32.totalorder %s754_s13, %s573_s17  ;;  %s579_s26 = scalar_lea.vmem %s578_s25, 256 }
  0x1b   : > { %p581_p1 = scmp.lt.s32.totalorder %s579_s26, %s573_s17 }
  0x1c   : > { %p575_p12 = pnand %p574_p11, %p710_p5 }
  0x1d   : > { %p582_p2 = por %p581_p1, %p580_p0 }
  0x1e   : > { %p576_p13 = pneg %p575_p12 }
  0x20   : > { %p583_p3 = pnand %p582_p2, %p576_p13 }
  0x8c   : > { %v401_v29 = vpop.permute.xlu0 %400 }
  0xed   : > { %v302_v11 = vpop.f32.mrb[0].mxu0 }
  0xee   : > { %v303_v12 = vadd.f32 %v485_v10, %v302_v11  ;;  %v510_v13 = vpop.f32.mrb[1].mxu0 }
  0xf0   : > { %v306_v14 = vsub.f32 0.0, %v303_v12 }
  0xf2   : > { %v307_v15 = vmul.f32 1.442695, %v306_v14 }
  0xf4   : > { %565 = vpow2.f32 %v307_v15 }
  0xfe   : > { %v566_v16 = vpop.eup %565 }
  0xff   : > { %v309_v17 = vadd.f32 1.0, %v566_v16 }
 0x101   : > { %567 = vrcp.f32 %v309_v17 }
 0x10b   : > { %v568_v18 = vpop.eup %567 }
 0x10c   : > { %v311_v19 = vmul.f32 %v568_v18, %v303_v12 }
 0x10e   : > { %514 = vmatmul.mubr.msk.f32.vlgmr.msra.gmra.mrb[0].mxu1 %vm320_vm2, %v311_v19 }
 0x1e1   : > { %v390_v21 = vpop.f32.mrb[0].mxu1 }
 0x1e2   : > { %v391_v22 = vadd.f32 %v487_v20, %v390_v21  ;;  %v515_v23 = vpop.f32.mrb[1].mxu1 }
 0x1e4   : > { %v394_v24 = vsub.f32 0.0, %v391_v22 }
 0x1e6   : > { %v395_v25 = vmul.f32 1.442695, %v394_v24 }
 0x1e8   : > { %569 = vpow2.f32 %v395_v25 }
 0x1f2   : > { %v570_v26 = vpop.eup %569 }
 0x1f3   : > { %v397_v27 = vadd.f32 1.0, %v570_v26 }
 0x1f5   : > { %571 = vrcp.f32 %v397_v27 }
 0x1ff   : > { %v572_v28 = vpop.eup %571 }
 0x200   : > { %v399_v30 = vmul.f32 %v572_v28, %v391_v22 }
 0x202   : > { %v403_v31 = vsel %vm232_vm1, %v399_v30, %v401_v29 }
 0x203   : > { %405 = vst.msk [vmem:[%s215_s12] sm:$0xff] %vm404_vm3, %v403_v31 }
 0x204   : > { %586 = shalt.err (!%p583_p3)
}
 0x205   : > { %s587_s30 = scalar_lea.hbm %s752_s16, 128  ;;  %s591_s8 = scalar_lea.hbm %s800_s5, 384 }
 0x206   : > { %p588_p4 = scmp.ne.s32.totalorder %s752_s16, %s587_s30  ;;  %p592_p9 = scmp.lt.u32.totalorder %s752_s16, %s800_s5 }
 0x207   : > { %p593_p10 = scmp.lt.u32.totalorder %s591_s8, %s587_s30  ;;  %p595_p12 = scmp.lt.u32.totalorder %s587_s30, %s752_s16 }
 0x208   : > { %p589_p7 = pnand %p588_p4, %p710_p5 }
 0x209   : > { %p594_p11 = por %p593_p10, %p592_p9 }
 0x20a   : > { %p590_p8 = pneg %p589_p7 }
 0x20b   : > { %p596_p13 = por %p595_p12, %p594_p11 }
 0x20d   : > { %p597_p0 = pnand %p596_p13, %p590_p8 }
 0x20f   : > { %600 = shalt.err (!%p597_p0)
}
 0x210   : > { %522 = dma.vmem_to_hbm [thread:$0]  (%p710_p5), %s754_s13, 128, %s752_s16, %s407_s22  }
 0x211 PF: > { %p528_p1 = scmp.ge.s32.totalorder %s635_s21, 2  ;;  %s432_s11 = sand.u32 1, %s623_s18  }
 0x212   : > { %s433_s12 = scalar_lea.sflag [#allocation3], %s432_s11 }
 0x213   : > { %p525_p2 = pnand %p528_p1, %p714_p6 }
 0x215   : > { %618 = dma.done.wait (!%p525_p2), %s433_s12, 128  }
 0x216   : > { %620 = vsyncadd (!%p525_p2), %s433_s12, 4294967168  ;;  %p15_p3 = scmp.ge.s32.totalorder %s697_s24, 5   ;;  %s803_s18 = smov %s627_s19 }
 0x217   : > { %s804_s19 = smov %s631_s20  ;;  %s805_s20 = smov %s708_s27 }
 0x218   : > { %s806_s21 = smov %s697_s24  ;;  %17 = sbr.rel (!%p15_p3) target bundleno = 3 (0x3), region = 75 }
 0x21f   :  { %438 = vsyncpa [#allocation3], 1 }
 0x220   :  { %440 = vsyncpa [#allocation3 + $0x1], 1 }

</bundles_post_ra>
